<compile_context>
chip_gen: v5e
topology: v5e:2x2
jax: 0.10.0
libtpu: 0.0.40
codegen_flags: <defaults>
</compile_context>

<pallas_src>
import jax
import jax.numpy as jnp
from jax.experimental import pallas as pl
from jax.experimental.pallas import tpu as pltpu

VMEM = pltpu.MemorySpace.VMEM
SMEM = pltpu.MemorySpace.SMEM

OUT_LANES = 128          # lane-dense packed output width
HID = 200                # logical hidden_dim of the PyTorch module
HID_PAD = 256            # 128-lane-aligned padded hidden_dim


def _vmem_specs(n):
    return [pl.BlockSpec(memory_space=VMEM) for _ in range(n)]


# --------------------------------------------------------------------------
# Kernel 1: Linear -> Tanh -> Linear  (PrefixEncoder.trans)
#   Computed once for pre_seq_len rows only (batch copies are identical).
#   TODO(synk): tile over the L*2*H output columns with a grid + vmem_limit
#               for production RoBERTa sizes (L*2*H ~ 18K).
# --------------------------------------------------------------------------
def mlp2_tanh_kernel(x_ref, w1_ref, b1_ref, w2_ref, b2_ref, o_ref):
    x = x_ref[...].astype(jnp.float32)
    h = jnp.tanh(
        jnp.dot(x, w1_ref[...], preferred_element_type=jnp.float32) + b1_ref[...]
    )
    o = jnp.dot(h, w2_ref[...], preferred_element_type=jnp.float32) + b2_ref[...]
    o_ref[...] = o.astype(o_ref.dtype)


def mlp2_tanh(x, w1, b1, w2, b2):
    R = x.shape[0]
    O = w2.shape[1]
    return pl.pallas_call(
        mlp2_tanh_kernel,
        out_shape=jax.ShapeDtypeStruct((R, O), jnp.float32),
        in_specs=_vmem_specs(5),
        out_specs=pl.BlockSpec(memory_space=VMEM),
    )(x, w1, b1.reshape(1, -1), w2, b2.reshape(1, -1))


# --------------------------------------------------------------------------
# Kernel 2: fused forward — RoBERTa stub + fin-transformer stub + multimodal
# head, single pallas_call, single lane-dense output slab.
#
# Output slab [B, 128] layout:
#   cols 0:2  softmax(plm_classifier(news))
#   cols 2:4  softmax(trm_classifier(data))
#   cols 4:6  softmax(cat_classifier([news_h | data_h]))
#   cols 6:8  loss_align (broadcast; wrapper reads [0, 6])
#   cols 8:   zero padding
# --------------------------------------------------------------------------
def fused_forward_kernel(invt_ref,                    # SMEM (1,1): 1/temperature
                         emb_ref, mask_ref, hist_ref,  # [B,S,H], [B,S], [B,F,T]
                         w_rb_ref, b_rb_ref,           # roberta stub  [H,H],[1,H]
                         w_fin_ref, b_fin_ref,         # fin stub      [F,D],[1,D]
                         wtp_ref, btp_ref,             # trm_proj      [D,256],[1,256]
                         wpp_ref, bpp_ref,             # plm_proj      [H,256],[1,256]
                         wpc_ref, bpc_ref,             # plm_classifier[H,2],[1,2]
                         wtc_ref, btc_ref,             # trm_classifier[D,2],[1,2]
                         wcct_ref, wccb_ref, bcc_ref,  # cat_classifier halves [256,2]x2,[1,2]
                         o_ref):                       # [B,128]
    # --- RoBERTa stand-in: masked mean-pool + tanh(Linear) -> news [B,H] ---
    # TODO(synk): RobertaModel (pretrained PLM using past_key_values) has no
    #             Pallas equivalent; deterministic stub.
    emb = emb_ref[...].astype(jnp.float32)              # [B,S,H]
    mask = mask_ref[...].astype(jnp.float32)             # [B,S]
    num = jnp.sum(emb * mask[:, :, None], axis=1)         # [B,H]
    den = jnp.maximum(jnp.sum(mask, axis=1, keepdims=True), 1.0)
    news = jnp.tanh(
        jnp.dot(num / den, w_rb_ref[...], preferred_element_type=jnp.float32)
        + b_rb_ref[...]
    )                                                     # [B,H]

    # --- fin transformer stand-in: mean over time (lanes) + tanh(Linear) ---
    # TODO(synk): Transformer() is undefined / loaded from a .pt checkpoint;
    #             deterministic stub producing data_output.
    hist = hist_ref[...].astype(jnp.float32)              # [B,F,T] (T on lanes)
    pooled = jnp.mean(hist, axis=-1)                       # [B,F]
    data = jnp.tanh(
        jnp.dot(pooled, w_fin_ref[...], preferred_element_type=jnp.float32)
        + b_fin_ref[...]
    )                                                     # [B,D]

    # --- projections (lane-padded to 256; padded cols are exactly 0) ---
    data_h = jnp.tanh(
        jnp.dot(data, wtp_ref[...], preferred_element_type=jnp.float32) + btp_ref[...]
    )                                                     # [B,256]
    news_h = jnp.tanh(
        jnp.dot(news, wpp_ref[...], preferred_element_type=jnp.float32) + bpp_ref[...]
    )                                                     # [B,256]

    # --- alignment loss via NT dot_general + logsumexp ---
    inv_temp = invt_ref[0, 0]
    sim = jax.lax.dot_general(
        news_h, data_h,
        dimension_numbers=(((1,), (1,)), ((), ())),
        preferred_element_type=jnp.float32,
    ) * inv_temp                                          # [B,B]
    B = sim.shape[0]

    m1 = jnp.max(sim, axis=1, keepdims=True)               # [B,1]
    lse1 = m1 + jnp.log(jnp.sum(jnp.exp(sim - m1), axis=1, keepdims=True))
    m0 = jnp.max(sim, axis=0, keepdims=True)                # [1,B]
    lse0 = m0 + jnp.log(jnp.sum(jnp.exp(sim - m0), axis=0, keepdims=True))

    row = jax.lax.broadcasted_iota(jnp.int32, (B, B), 0)
    col = jax.lax.broadcasted_iota(jnp.int32, (B, B), 1)
    eye = (row == col).astype(jnp.float32)
    diag_r = jnp.sum(sim * eye, axis=1, keepdims=True)       # [B,1]
    diag_c = jnp.sum(sim * eye, axis=0, keepdims=True)       # [1,B]
    # -mean(log softmax(sim,1)[i,i]) - mean(log softmax(sim,0)[i,i])
    loss_align = -(jnp.mean(diag_r - lse1) + jnp.mean(diag_c - lse0))

    # --- classifiers (softmax over last dim of size 2) ---
    def _softmax_last(z):
        z = z - jnp.max(z, axis=-1, keepdims=True)
        e = jnp.exp(z)
        return e / jnp.sum(e, axis=-1, keepdims=True)

    ln = _softmax_last(
        jnp.dot(news, wpc_ref[...], preferred_element_type=jnp.float32) + bpc_ref[...]
    )                                                     # [B,2]
    ld = _softmax_last(
        jnp.dot(data, wtc_ref[...], preferred_element_type=jnp.float32) + btc_ref[...]
    )                                                     # [B,2]
    # cat classifier without concatenate: [news_h | data_h] @ W == news_h@Wtop + data_h@Wbot
    lc = _softmax_last(
        jnp.dot(news_h, wcct_ref[...], preferred_element_type=jnp.float32)
        + jnp.dot(data_h, wccb_ref[...], preferred_element_type=jnp.float32)
        + bcc_ref[...]
    )                                                     # [B,2]

    # --- single lane-dense output slab ---
    loss_cols = jnp.broadcast_to(jnp.reshape(loss_align, (1, 1)), (B, 2))
    pad = jnp.zeros((B, o_ref.shape[1] - 8), jnp.float32)
    o_ref[...] = jnp.concatenate([ln, ld, lc, loss_cols, pad], axis=-1).astype(
        o_ref.dtype
    )


def fused_forward(emb, mask, hist_t, params, inv_temp):
    B = emb.shape[0]
    p = params
    inv_t = jnp.asarray([[inv_temp]], dtype=jnp.float32)
    args = (
        inv_t, emb, mask, hist_t,
        p["w_rb"], p["b_rb"].reshape(1, -1),
        p["w_fin"], p["b_fin"].reshape(1, -1),
        p["w_trm_proj"], p["b_trm_proj"].reshape(1, -1),
        p["w_plm_proj"], p["b_plm_proj"].reshape(1, -1),
        p["w_plm_cls"], p["b_plm_cls"].reshape(1, -1),
        p["w_trm_cls"], p["b_trm_cls"].reshape(1, -1),
        p["w_cat_cls_top"], p["w_cat_cls_bot"], p["b_cat_cls"].reshape(1, -1),
    )
    in_specs = [pl.BlockSpec(memory_space=SMEM)] + _vmem_specs(len(args) - 1)
    return pl.pallas_call(
        fused_forward_kernel,
        out_shape=jax.ShapeDtypeStruct((B, OUT_LANES), jnp.float32),
        in_specs=in_specs,
        out_specs=pl.BlockSpec(memory_space=VMEM),
    )(*args)


# --------------------------------------------------------------------------
# Model wrapper with deterministic parameter init
# --------------------------------------------------------------------------
class MultimodalModelPallas:
    def __init__(self, config, temperature, d_trm, vocab_size, key):
        self.config = config
        self.temp = float(temperature)
        self.hidden_dim = HID
        H = config["hidden_size"]
        L = config["num_hidden_layers"]
        A = config["num_attention_heads"]
        self.pre_seq_len = config["pre_seq_len"]
        self.n_layer = L
        self.n_head = A
        self.n_embd = H // A
        self.d_trm = d_trm

        def nrm(k, shape, scale=0.02):
            return (scale * jax.random.normal(k, shape)).astype(jnp.float32)

        ks = jax.random.split(key, 16)
        P = config["prefix_hidden_size"]

        # projection weights padded 200 -> 256 lanes (padded cols/rows are zero;
        # numerically identical to the 200-wide module).
        w_tp = jnp.pad(nrm(ks[6], (d_trm, HID)), ((0, 0), (0, HID_PAD - HID)))
        w_pp = jnp.pad(nrm(ks[7], (H, HID)), ((0, 0), (0, HID_PAD - HID)))
        w_cc = nrm(ks[10], (2 * HID, 2))
        w_cc_top = jnp.pad(w_cc[:HID], ((0, HID_PAD - HID), (0, 0)))
        w_cc_bot = jnp.pad(w_cc[HID:], ((0, HID_PAD - HID), (0, 0)))

        self.params = {
            # prefix encoder (prefix_projection=True)
            "prefix_emb": nrm(ks[0], (self.pre_seq_len, H)),
            "w_pre1": nrm(ks[1], (H, P)),
            "b_pre1": jnp.zeros((P,), jnp.float32),
            "w_pre2": nrm(ks[2], (P, L * 2 * H)),
            "b_pre2": jnp.zeros((L * 2 * H,), jnp.float32),
            # roberta stub
            "tok_emb": nrm(ks[3], (vocab_size, H)),
            "w_rb": nrm(ks[4], (H, H)),
            "b_rb": jnp.zeros((H,), jnp.float32),
            # fin transformer stub (features=5 -> d_model)
            "w_fin": nrm(ks[5], (5, d_trm)),
            "b_fin": jnp.zeros((d_trm,), jnp.float32),
            # multimodal head (lane-padded)
            "w_trm_proj": w_tp,
            "b_trm_proj": jnp.zeros((HID_PAD,), jnp.float32),
            "w_plm_proj": w_pp,
            "b_plm_proj": jnp.zeros((HID_PAD,), jnp.float32),
            "w_plm_cls": nrm(ks[8], (H, 2)),
            "b_plm_cls": jnp.zeros((2,), jnp.float32),
            "w_trm_cls": nrm(ks[9], (d_trm, 2)),
            "b_trm_cls": jnp.zeros((2,), jnp.float32),
            "w_cat_cls_top": w_cc_top,
            "w_cat_cls_bot": w_cc_bot,
            "b_cat_cls": jnp.zeros((2,), jnp.float32),
        }

    def get_prompt(self, batch_size):
        p = self.params
        # All batch rows of the prefix are identical: run the MLP once for the
        # pre_seq_len rows, broadcast to batch afterwards (B x less work/DMA).
        prefix_tok = p["prefix_emb"]                         # [P, H]
        pkv = mlp2_tanh(prefix_tok, p["w_pre1"], p["b_pre1"],
                        p["w_pre2"], p["b_pre2"])            # [P, L*2*H]
        pkv = jnp.broadcast_to(pkv[None], (batch_size,) + pkv.shape)
        pkv = pkv.reshape(batch_size, self.pre_seq_len, self.n_layer * 2,
                          self.n_head, self.n_embd)
        # dropout == identity in eval mode
        pkv = jnp.transpose(pkv, (2, 0, 3, 1, 4))
        # split into n_layer chunks of 2 (key/value) -- glue only
        return jnp.split(pkv, self.n_layer, axis=0)

    def __call__(self, input_ids, attention_mask, history_data):
        p = self.params
        B = input_ids.shape[0]

        # prefix past_key_values (computed for faithfulness; stub PLM ignores them)
        _past_key_values = self.get_prompt(B)
        prefix_mask = jnp.ones((B, self.pre_seq_len), jnp.float32)
        full_mask = jnp.concatenate([prefix_mask, attention_mask], axis=1)
        del full_mask  # TODO(synk): consumed only by the real RobertaModel

        # token embedding gather (outside the kernel), history with T on lanes
        emb = jnp.take(p["tok_emb"], input_ids, axis=0)          # [B, S, H]
        hist_t = jnp.transpose(history_data, (0, 2, 1))           # [B, F, T]

        out = fused_forward(emb, attention_mask.astype(jnp.float32), hist_t,
                            p, 1.0 / self.temp)                   # [B, 128]
        logits_news = out[:, 0:2]
        logits_data = out[:, 2:4]
        logits_cat = out[:, 4:6]
        loss_align = out[0, 6]
        return logits_news, logits_data, logits_cat, loss_align


if __name__ == "__main__":
    key = jax.random.PRNGKey(0)
    B, S, V = 2, 8, 50
    config = dict(
        hidden_size=32,
        num_hidden_layers=2,
        num_attention_heads=4,
        pre_seq_len=4,
        prefix_hidden_size=16,
        prefix_projection=True,
        hidden_dropout_prob=0.1,
        use_return_dict=True,
    )
    model = MultimodalModelPallas(config, temperature=0.1, d_trm=64,
                                  vocab_size=V, key=key)

    k1, k2 = jax.random.split(jax.random.fold_in(key, 123))
    input_ids = jax.random.randint(k1, (B, S), 0, V, dtype=jnp.int32)
    attention_mask = jnp.ones((B, S), jnp.float32)
    history_data = jax.random.normal(k2, (B, 200, 5), jnp.float32)

    out = model(input_ids=input_ids, attention_mask=attention_mask,
                history_data=history_data)
    out = jax.block_until_ready(out)
    print("KERNEL_OK")
</pallas_src>

<mosaic_0001>
module attributes {stable_mosaic.version = 11 : i64} {
  func.func @mlp2_tanh_kernel(%arg0: memref<4x32xf32, #tpu.memory_space<vmem>>, %arg1: memref<32x16xf32, #tpu.memory_space<vmem>>, %arg2: memref<1x16xf32, #tpu.memory_space<vmem>>, %arg3: memref<16x128xf32, #tpu.memory_space<vmem>>, %arg4: memref<1x128xf32, #tpu.memory_space<vmem>>, %arg5: memref<4x128xf32, #tpu.memory_space<vmem>>) attributes {dimension_semantics = [], scalar_prefetch = 0 : i64, scratch_operands = 0 : i64, tpu.core_type = #tpu.core_type<tc>} {
    %c0 = arith.constant 0 : index
    %c0_0 = arith.constant 0 : index
    %0 = vector.load %arg0[%c0, %c0_0] : memref<4x32xf32, #tpu.memory_space<vmem>>, vector<4x32xf32>
    %c0_1 = arith.constant 0 : index
    %c0_2 = arith.constant 0 : index
    %1 = vector.load %arg1[%c0_1, %c0_2] : memref<32x16xf32, #tpu.memory_space<vmem>>, vector<32x16xf32>
    %cst = arith.constant dense<0.000000e+00> : vector<4x16xf32>
    %2 = tpu.matmul %0, %1, %cst {dimension_numbers = #tpu.dot_dimension_numbers<[1], [0], [0], [1], [0, 0, 1, 1], [], []>} : vector<4x32xf32>, vector<32x16xf32>, vector<4x16xf32> -> vector<4x16xf32>
    %c0_3 = arith.constant 0 : index
    %c0_4 = arith.constant 0 : index
    %3 = vector.load %arg2[%c0_3, %c0_4] : memref<1x16xf32, #tpu.memory_space<vmem>>, vector<1x16xf32>
    %4 = vector.broadcast %3 : vector<1x16xf32> to vector<4x16xf32>
    %5 = arith.addf %2, %4 : vector<4x16xf32>
    %6 = math.tanh %5 : vector<4x16xf32>
    %c0_5 = arith.constant 0 : index
    %c0_6 = arith.constant 0 : index
    %7 = vector.load %arg3[%c0_5, %c0_6] : memref<16x128xf32, #tpu.memory_space<vmem>>, vector<16x128xf32>
    %cst_7 = arith.constant dense<0.000000e+00> : vector<4x128xf32>
    %8 = tpu.matmul %6, %7, %cst_7 {dimension_numbers = #tpu.dot_dimension_numbers<[1], [0], [0], [1], [0, 0, 1, 1], [], []>} : vector<4x16xf32>, vector<16x128xf32>, vector<4x128xf32> -> vector<4x128xf32>
    %c0_8 = arith.constant 0 : index
    %c0_9 = arith.constant 0 : index
    %9 = vector.load %arg4[%c0_8, %c0_9] : memref<1x128xf32, #tpu.memory_space<vmem>>, vector<1x128xf32>
    %10 = vector.broadcast %9 : vector<1x128xf32> to vector<4x128xf32>
    %11 = arith.addf %8, %10 : vector<4x128xf32>
    %c0_10 = arith.constant 0 : index
    %c0_11 = arith.constant 0 : index
    %12 = vector.load %arg5[%c0_10, %c0_11] : memref<4x128xf32, #tpu.memory_space<vmem>>, vector<4x128xf32>
    tpu.vector_store %arg5[%c0_10, %c0_11], %11 {strides = array<i32>} : memref<4x128xf32, #tpu.memory_space<vmem>>, vector<4x128xf32>,
    return
  }
}

</mosaic_0001>

<bundles_post_ra>
// kernel: tpu_custom_call.1
= control target key start
LH: loop header
LB: loop body
LE: loop exit
PB: predicated region body
PF: predicated region fallthrough
CT: control target
= control target key end

     0   :  { %s196_s0 = inlined_call_operand.vmem [shape: f32[4,32], index: 0, kind: input, shape index: {}]   ;;  %s197_s1 = inlined_call_operand.vmem [shape: f32[32,16], index: 1, kind: input, shape index: {}]   ;;  %s198_s2 = inlined_call_operand.vmem [shape: f32[1,16], index: 2, kind: input, shape index: {}]   ;;  %s199_s3 = inlined_call_operand.vmem [shape: f32[16,128], index: 3, kind: input, shape index: {}]   ;;  %s200_s4 = inlined_call_operand.vmem [shape: f32[1,128], index: 4, kind: input, shape index: {}]   ;;  %s201_s5 = inlined_call_operand.hbm [shape: f32[4,128], index: 5, kind: output, shape index: {}]  }
   0x1   :  { %v25_v0 = vld [vmem:[%s197_s1 + $0x18] sm:$0xff]  ;;  %v24_v1 = vld [vmem:[%s197_s1 + $0x10] sm:$0xff]  ;;  %v23_v2 = vld [vmem:[%s197_s1 + $0x8] sm:$0xff] }
   0x2   :  { %46 = vmatpush.msra.mxu0 %v25_v0 }
   0x3   :  { %10 = vsyncpa [#allocation3], 0  ;;  %v22_v3 = vld [vmem:[%s197_s1] sm:$0xff]  ;;  %vm30_vm0 = vcmask 261120   ;;  %v56_v5 = vld [vmem:[%s199_s3 + $0x8] sm:$0xff]  ;;  %vm61_vm1 = vcmask 130048  }
   0x4   :  { %47 = vmatpush.msra.mxu0 %v24_v1  ;;  %v21_v4 = vld [vmem:[%s196_s0] sm:$0xf]  ;;  %79 = vmatpush.msra.mxu1 %v56_v5  ;;  %s135_s9 = smov [#allocation2]   ;;  %s93_s12 = sshll.u32 %s201_s5, 4  ;;  %s94_s12 = int_to_ptr.hbm [resolvable:$true] %s93_s12 }
   0x5   :  { %v55_v6 = vld [vmem:[%s199_s3] sm:$0xff]  ;;  %s91_s10 = sshll.u32 %s135_s9, 4  ;;  %s92_s10 = int_to_ptr.vmem [resolvable:$true] %s91_s10 }
   0x6   :  { %48 = vmatpush.msra.mxu0 %v23_v2  ;;  %80 = vmatpush.msra.mxu1 %v55_v6  ;;  %v105_v7 = vld [vmem:[%s198_s2] ss:$0 sm:$0xff] }
   0x7   :  { %v106_v11 = vld [vmem:[%s200_s4] ss:$0 sm:$0xff] }
   0x8   :  { %49 = vmatpush.msra.mxu0 %v22_v3 }
   0x9   :  { %102 = vmatmul.msk.f32.vlgmr.msra.gmra.mxu0 %vm30_vm0, %v21_v4 }
  0x86   :  { %v51_v8 = vpop.f32.mrf.mxu0 }
  0x87   :  { %v52_v9 = vadd.f32 %v105_v7, %v51_v8 }
  0x89   :  { %107 = vtanh.f32 %v52_v9 }
  0x8f   :  { %v108_v10 = vpop.eup %107 }
  0x90   :  { %103 = vmatmul.msk.f32.vlgmr.msra.gmra.mxu1 %vm61_vm1, %v108_v10 }
 0x10d   :  { %v82_v12 = vpop.f32.mrf.mxu1 }
 0x10e   :  { %v83_v13 = vadd.f32 %v106_v11, %v82_v12 }
 0x110   :  { %85 = vst [vmem:[#allocation2] sm:$0xf] %v83_v13 }
 0x111   :  { %96 = dma.vmem_to_hbm [thread:$0]  %s92_s10, 64, %s94_s12, [#allocation3]  }
 0x112   :  { %133 = dma.done.wait [#allocation3], 64  }
 0x113   :  { %134 = vsyncadd [#allocation3], 4294967232 }
 0x114   :  { %101 = vsyncpa [#allocation3], 1 }

</bundles_post_ra>
